<compile_context>
chip_gen: v7x
topology: tpu7x:2x2x1
jax: 0.10.0
libtpu: 0.0.40
codegen_flags: <defaults>
</compile_context>

<pallas_src>
import functools

import jax
import jax.numpy as jnp
from jax import lax
from jax.experimental import pallas as pl
from jax.experimental.pallas import tpu as pltpu

SUBLANE = 8    # output rows (2 used, padded to one sublane group)
LANE = 128     # lane width; batch tile is a multiple of this


def _round_up(n, m):
    return ((n + m - 1) // m) * m


def _x_buffer_budget_bytes():
    """Per-generation budget for the double-buffered x tile."""
    cap = 128 << 20                      # v5e / v6e physical VMEM per core
    try:
        cap = int(pltpu.get_tpu_info().vmem_capacity_bytes)
    except Exception:
        pass
    if cap <= (64 << 20):                # v7x-class: 64 MiB per TensorCore
        return 20 << 20
    return 24 << 20                      # v5e / v6e


def _pick_tb(B, F, x_buf_budget):
    """Batch-tile rows: multiple of 128, sized by a VMEM byte budget that
    accounts for lane padding; no artificial row cap."""
    f_pad = _round_up(F, LANE)
    bytes_per_row = 4 * (f_pad + SUBLANE)           # x row + output column (f32)
    max_rows = max(LANE, x_buf_budget // (2 * bytes_per_row))   # 2 = double buffer
    tb = max(LANE, (max_rows // LANE) * LANE)
    tb = min(tb, _round_up(B, LANE))                # small B -> single step
    n_steps = (B + tb - 1) // tb
    if n_steps > 1:
        # v7x megacore: >= 2 steps per TensorCore, pipeline stays non-degenerate.
        while tb > LANE and (B + tb - 1) // tb < 4:
            tb -= LANE
    return tb


def _vmem_limit_bytes(tb, F):
    f_pad = _round_up(F, LANE)
    x_b = tb * f_pad * 4                              # x tile (lane-padded)
    o_b = SUBLANE * tb * 4                            # output tile
    w_b = _round_up(F, SUBLANE) * LANE * 4            # (F, 8) lane-pads 8 -> 128
    return max(2 * (x_b + o_b + w_b) + (4 << 20), 16 << 20)


def pack_params(color_w, bright_w, c2b_w, b2c_w, color_b, bright_b):
    """One-time packing of the module parameters (outside the hot path).

    Returns Wt of shape (F, 8) (pre-transposed so the kernel uses the canonical
    x @ Wt contraction) and a (2,) bias vector for SMEM."""
    mid = color_w.shape[0]
    F = 2 * mid
    Wt = jnp.zeros((F, SUBLANE), jnp.float32)
    Wt = Wt.at[:mid, 0].set(color_w).at[mid:, 0].set(b2c_w)       # -> color_output
    Wt = Wt.at[:mid, 1].set(c2b_w).at[mid:, 1].set(bright_w)      # -> brightness_output
    b = jnp.concatenate([color_b.reshape(1), bright_b.reshape(1)]).astype(jnp.float32)
    return Wt, b


def attn_neuron_kernel(w_ref, b_ref, x_ref, out_ref):
    # w: (F, 8) VMEM, b: (2,) SMEM, x: (tb, F) VMEM, out: (8, tb) VMEM
    acc = jnp.dot(x_ref[...], w_ref[...],
                  preferred_element_type=jnp.float32)        # (tb, 8)  MXU, f32 acc
    out = acc.T                                              # tiny (tb,8)->(8,tb) XLU
    row = lax.broadcasted_iota(jnp.int32, out.shape, 0)
    bias = jnp.where(row == 0, b_ref[0],
                     jnp.where(row == 1, b_ref[1], 0.0))
    out_ref[...] = jnp.maximum(out + bias, 0.0)              # bias + ReLU, lane-dense store


@functools.partial(jax.jit, static_argnames=("tile_rows",))
def attention_multiweight_neuron(x, W_packed, b_packed, *, tile_rows=None):
    """Returns (color_output, brightness_output), each shape (B,)."""
    B, F = x.shape
    assert F % 2 == 0, "input_size must be even (color|brightness split)"
    assert W_packed.shape == (F, SUBLANE)
    assert b_packed.shape == (2,)

    tb = tile_rows if tile_rows is not None else _pick_tb(B, F, _x_buffer_budget_bytes())
    grid = (pl.cdiv(B, tb),)

    out = pl.pallas_call(
        attn_neuron_kernel,
        out_shape=jax.ShapeDtypeStruct((SUBLANE, B), jnp.float32),
        grid=grid,
        in_specs=[
            pl.BlockSpec((F, SUBLANE), lambda i: (0, 0)),             # weights: resident
            pl.BlockSpec(memory_space=pltpu.MemorySpace.SMEM),        # bias scalars
            pl.BlockSpec((tb, F), lambda i: (i, 0)),                  # x batch tile
        ],
        out_specs=pl.BlockSpec((SUBLANE, tb), lambda i: (0, i)),      # lane-dense output
        compiler_params=pltpu.CompilerParams(
            dimension_semantics=("parallel",),                        # megacore on v7x
            vmem_limit_bytes=_vmem_limit_bytes(tb, F)),
        cost_estimate=pl.CostEstimate(
            flops=2 * B * F * SUBLANE,
            transcendentals=0,
            bytes_accessed=B * F * 4 + SUBLANE * B * 4 + F * SUBLANE * 4 + 8),
    )(W_packed, b_packed, x)

    # Rows 0/1 are contiguous lane-dense reads; no padded HBM columns to drop.
    return out[0], out[1]


def reference(x, color_w, bright_w, c2b_w, b2c_w, color_b, bright_b):
    mid = x.shape[1] // 2
    color, bright = x[:, :mid], x[:, mid:]
    co = color @ color_w + bright @ b2c_w + color_b[0]
    bo = bright @ bright_w + color @ c2b_w + bright_b[0]
    return jnp.maximum(co, 0.0), jnp.maximum(bo, 0.0)


if __name__ == "__main__":
    B = 300                  # deliberately not 8/128-aligned: exercises ragged last block
    input_size = 64          # feature_size = 32
    mid = input_size // 2

    key = jax.random.PRNGKey(0)
    kx, k1, k2, k3, k4 = jax.random.split(key, 5)

    x = jax.random.normal(kx, (B, input_size), dtype=jnp.float32)

    # Parameter init matching torch.randn(feature_size) * 0.01 (deterministic here).
    color_w = jax.random.normal(k1, (mid,), dtype=jnp.float32) * 0.01
    bright_w = jax.random.normal(k2, (mid,), dtype=jnp.float32) * 0.01
    c2b_w = jax.random.normal(k3, (mid,), dtype=jnp.float32) * 0.01
    b2c_w = jax.random.normal(k4, (mid,), dtype=jnp.float32) * 0.01
    color_b = jnp.full((1,), 0.05, jnp.float32)     # non-zero to exercise the bias path
    bright_b = jnp.full((1,), -0.03, jnp.float32)

    # One-time parameter packing (not part of the per-call hot path).
    W_packed, b_packed = pack_params(color_w, bright_w, c2b_w, b2c_w,
                                     color_b, bright_b)
    W_packed, b_packed = jax.block_until_ready((W_packed, b_packed))

    co_ref, bo_ref = reference(x, color_w, bright_w, c2b_w, b2c_w, color_b, bright_b)

    # Default path: VMEM-budget tile -> collapses to a single grid step here.
    co, bo = attention_multiweight_neuron(x, W_packed, b_packed)
    jax.block_until_ready((co, bo))
    assert co.shape == (B,) and bo.shape == (B,)
    assert jnp.allclose(co, co_ref, atol=1e-5, rtol=1e-5)
    assert jnp.allclose(bo, bo_ref, atol=1e-5, rtol=1e-5)

    # Forced small tile: multi-step grid + ragged last block, still no x padding.
    co2, bo2 = attention_multiweight_neuron(x, W_packed, b_packed, tile_rows=128)
    jax.block_until_ready((co2, bo2))
    assert jnp.allclose(co2, co_ref, atol=1e-5, rtol=1e-5)
    assert jnp.allclose(bo2, bo_ref, atol=1e-5, rtol=1e-5)

    print("KERNEL_OK")
</pallas_src>

<mosaic_0001>
module attributes {stable_mosaic.version = 11 : i64} {
  func.func @attn_neuron_kernel(%arg0: i32, %arg1: memref<64x8xf32, #tpu.memory_space<vmem>>, %arg2: memref<2xf32, #tpu.memory_space<smem>>, %arg3: memref<384x64xf32, #tpu.memory_space<vmem>>, %arg4: memref<8x384xf32, #tpu.memory_space<vmem>>) attributes {dimension_semantics = [#tpu.dimension_semantics<parallel>], iteration_bounds = array<i64: 1>, scalar_prefetch = 0 : i64, scratch_operands = 0 : i64, tpu.core_type = #tpu.core_type<tc>, window_params = [{pipeline_mode = #tpu.pipeline_mode<synchronous>, transform_indices = @transform_0, window_bounds = array<i64: 64, 8>}, {transform_indices = @transform_1, window_bounds = array<i64: 2>}, {transform_indices = @transform_2, window_bounds = array<i64: 384, 64>}, {transform_indices = @transform_3, window_bounds = array<i64: 8, 384>}]} {
    %c0 = arith.constant 0 : index
    %c0_0 = arith.constant 0 : index
    %0 = vector.load %arg3[%c0, %c0_0] : memref<384x64xf32, #tpu.memory_space<vmem>>, vector<384x64xf32>
    %c0_1 = arith.constant 0 : index
    %c0_2 = arith.constant 0 : index
    %1 = vector.load %arg1[%c0_1, %c0_2] : memref<64x8xf32, #tpu.memory_space<vmem>>, vector<64x8xf32>
    %cst = arith.constant dense<0.000000e+00> : vector<384x8xf32>
    %2 = tpu.matmul %0, %1, %cst {dimension_numbers = #tpu.dot_dimension_numbers<[1], [0], [0], [1], [0, 0, 1, 1], [], []>} : vector<384x64xf32>, vector<64x8xf32>, vector<384x8xf32> -> vector<384x8xf32>
    %3 = tpu.transpose %2, [1, 0] : vector<384x8xf32> -> vector<8x384xf32>
    %4 = tpu.iota {dimensions = array<i32: 0>} : vector<8x384xi32>
    %c0_i32 = arith.constant 0 : i32
    %5 = vector.broadcast %c0_i32 : i32 to vector<8x384xi32>
    %6 = arith.cmpi eq, %4, %5 : vector<8x384xi32>
    %c0_3 = arith.constant 0 : index
    %7 = memref.load %arg2[%c0_3] : memref<2xf32, #tpu.memory_space<smem>>
    %c1_i32 = arith.constant 1 : i32
    %8 = vector.broadcast %c1_i32 : i32 to vector<8x384xi32>
    %9 = arith.cmpi eq, %4, %8 : vector<8x384xi32>
    %c1 = arith.constant 1 : index
    %10 = memref.load %arg2[%c1] : memref<2xf32, #tpu.memory_space<smem>>
    %cst_4 = arith.constant 0.000000e+00 : f32
    %11 = vector.broadcast %10 : f32 to vector<8x384xf32>
    %12 = vector.broadcast %cst_4 : f32 to vector<8x384xf32>
    %13 = arith.select %9, %11, %12 : vector<8x384xi1>, vector<8x384xf32>
    %14 = vector.broadcast %7 : f32 to vector<8x384xf32>
    %15 = arith.select %6, %14, %13 : vector<8x384xi1>, vector<8x384xf32>
    %16 = arith.addf %3, %15 : vector<8x384xf32>
    %cst_5 = arith.constant 0.000000e+00 : f32
    %17 = vector.broadcast %cst_5 : f32 to vector<8x384xf32>
    %18 = arith.maximumf %16, %17 : vector<8x384xf32>
    %c0_6 = arith.constant 0 : index
    %c0_7 = arith.constant 0 : index
    %19 = vector.load %arg4[%c0_6, %c0_7] : memref<8x384xf32, #tpu.memory_space<vmem>>, vector<8x384xf32>
    tpu.vector_store %arg4[%c0_6, %c0_7], %18 {strides = array<i32>} : memref<8x384xf32, #tpu.memory_space<vmem>>, vector<8x384xf32>,
    return
  }
  func.func @transform_0(%arg0: i32) -> (i32, i32) {
    %c0_i32 = arith.constant 0 : i32
    %c0_i32_0 = arith.constant 0 : i32
    %c0_i32_1 = arith.constant 0 : i32
    return %c0_i32, %c0_i32_0 : i32, i32
  }
  func.func @transform_1(%arg0: i32) -> i32 {
    %c0_i32 = arith.constant 0 : i32
    %c0_i32_0 = arith.constant 0 : i32
    return %c0_i32 : i32
  }
  func.func @transform_2(%arg0: i32) -> (i32, i32) {
    %c0_i32 = arith.constant 0 : i32
    %c0_i32_0 = arith.constant 0 : i32
    return %arg0, %c0_i32 : i32, i32
  }
  func.func @transform_3(%arg0: i32) -> (i32, i32) {
    %c0_i32 = arith.constant 0 : i32
    %c0_i32_0 = arith.constant 0 : i32
    return %c0_i32, %arg0 : i32, i32
  }
}

</mosaic_0001>

<bundles_post_ra>
// kernel: attention_multiweight_neuron.1
= control target key start
LH: loop header
LB: loop body
LE: loop exit
PB: predicated region body
PF: predicated region fallthrough
CT: control target
= control target key end

     0   :  { %8 = vsyncpa [#allocation3], 0  ;;  %s1158_s0 = inlined_call_operand.vmem [shape: f32[64,8], index: 0, kind: input, shape index: {}]   ;;  %s1159_s1 = inlined_call_operand.vmem [shape: f32[2], index: 1, kind: input, shape index: {}]   ;;  %s1160_s2 = inlined_call_operand.vmem [shape: f32[300,64], index: 2, kind: input, shape index: {}]   ;;  %s1161_s3 = inlined_call_operand.vmem [shape: f32[8,300], index: 3, kind: output, shape index: {}]  }
   0x1   :  { %s17_s14 = sshll.u32 %s1159_s1, 4  ;;  %s18_s14 = int_to_ptr.vmem [resolvable:$true] %s17_s14 }
   0x2   :  { %s871_s15 = scalar_lea.vmem %s18_s14, 16  ;;  %p876_p1 = scmp.lt.s32.totalorder %s18_s14, %s18_s14 }
   0x3   :  { %p872_p0 = scmp.ne.s32.totalorder %s18_s14, %s871_s15  ;;  %p877_p2 = scmp.lt.s32.totalorder %s871_s15, %s871_s15 }
   0x5   :  { %p878_p3 = por %p877_p2, %p876_p1 }
   0x7   :  { %p879_p4 = pnand %p878_p3, %p872_p0 }
   0x9   :  { %882 = shalt.err (!%p879_p4)
}
   0xa   :  { %s885_s16 = smov [#allocation2]  }
   0xb   :  { %20 = dma.vmem_to_smem %s18_s14, 16, %s885_s16, [#allocation3]  }
   0xc   :  { %883 = dma.done.wait [#allocation3], 16  }
   0xd   :  { %884 = vsyncadd [#allocation3], 4294967280 }
   0xe   :  { %26 = sfence }
   0xf   :  { %v75_v0 = vld [vmem:[%s1158_s0] sm:$0xff]  ;;  %v76_v1 = vld [vmem:[%s1158_s0 + $0x8] sm:$0xff]  ;;  %v77_v2 = vld [vmem:[%s1158_s0 + $0x10] sm:$0xff]  ;;  %vm83_vm0 = vcmask 523264   ;;  %s632_s13 = sld [smem:[#allocation2]] }
  0x10   :  { %v846_v3 = vpack.c.bf16 %v76_v1, %v75_v0  ;;  %v78_v4 = vld [vmem:[%s1158_s0 + $0x18] sm:$0xff]  ;;  %v79_v6 = vld [vmem:[%s1158_s0 + $0x20] sm:$0xff]  ;;  %v80_v7 = vld [vmem:[%s1158_s0 + $0x28] sm:$0xff] }
  0x11   :  { %v850_v5 = vpack.c.bf16 %v78_v4, %v77_v2  ;;  %v27_v8 = vld [vmem:[%s1160_s2] sm:$0xff]  ;;  %v854_v9 = vpack.c.bf16 %v80_v7, %v79_v6  ;;  %v81_v10 = vld [vmem:[%s1158_s0 + $0x30] sm:$0xff]  ;;  %v82_v11 = vld [vmem:[%s1158_s0 + $0x38] sm:$0xff] }
  0x12   :  { %847 = vmatprep.subr.bf16.mxu0 %v846_v3  ;;  %774 = vmatprep.mubr.msk.f32.mxu0 %vm83_vm0, %v27_v8  ;;  %v858_v12 = vpack.c.bf16 %v82_v11, %v81_v10  ;;  %v51_v13 = vld [vmem:[%s1160_s2 + $0xc0] sm:$0xff]  ;;  %v28_v14 = vld [vmem:[%s1160_s2 + $0x8] sm:$0xff]  ;;  %v29_v15 = vld [vmem:[%s1160_s2 + $0x10] sm:$0xff] }
  0x13   :  { %849 = vmatpush3.bf16.msra.mxu0 %v846_v3  ;;  %862 = vmatprep.subr.bf16.mxu1 %v846_v3  ;;  %v52_v16 = vld [vmem:[%s1160_s2 + $0xc8] sm:$0xff]  ;;  %v53_v17 = vld [vmem:[%s1160_s2 + $0xd0] sm:$0xff]  ;;  %v30_v18 = vld [vmem:[%s1160_s2 + $0x18] sm:$0xff] }
  0x14   :  { %851 = vmatprep.subr.bf16.mxu0 %v850_v5  ;;  %866 = vmatpush3.bf16.msra.mxu1 %v846_v3  ;;  %v31_v19 = vld [vmem:[%s1160_s2 + $0x20] sm:$0xff]  ;;  %v54_v20 = vld [vmem:[%s1160_s2 + $0xd8] sm:$0xff]  ;;  %v32_v22 = vld [vmem:[%s1160_s2 + $0x28] sm:$0xff] }
  0x15   :  { %863 = vmatprep.subr.bf16.mxu1 %v850_v5  ;;  %810 = vmatprep.mubr.msk.f32.mxu1 %vm83_vm0, %v51_v13  ;;  %v55_v21 = vld [vmem:[%s1160_s2 + $0xe0] sm:$0xff]  ;;  %v33_v23 = vld [vmem:[%s1160_s2 + $0x30] sm:$0xff]  ;;  %v56_v24 = vld [vmem:[%s1160_s2 + $0xe8] sm:$0xff] }
  0x16   :  { %v57_v25 = vld [vmem:[%s1160_s2 + $0xf0] sm:$0xff]  ;;  %v34_v26 = vld [vmem:[%s1160_s2 + $0x38] sm:$0xff]  ;;  %v35_v27 = vld [vmem:[%s1160_s2 + $0x40] sm:$0xff] }
  0x17   :  { %853 = vmatpush3.bf16.msra.mxu0 %v850_v5  ;;  %v58_v28 = vld [vmem:[%s1160_s2 + $0xf8] sm:$0xff]  ;;  %v59_v29 = vld [vmem:[%s1160_s2 + $0x100] sm:$0xff]  ;;  %v36_v30 = vld [vmem:[%s1160_s2 + $0x48] sm:$0xff] }
  0x18   :  { %855 = vmatprep.subr.bf16.mxu0 %v854_v9  ;;  %867 = vmatpush3.bf16.msra.mxu1 %v850_v5  ;;  %v37_v31 = vld [vmem:[%s1160_s2 + $0x50] sm:$0xff]  ;;  %v60_v32 = vld [vmem:[%s1160_s2 + $0x108] sm:$0xff]  ;;  %v38_v34 = vld [vmem:[%s1160_s2 + $0x58] sm:$0xff] }
  0x19   :  { %864 = vmatprep.subr.bf16.mxu1 %v854_v9  ;;  %v61_v33 = vld [vmem:[%s1160_s2 + $0x110] sm:$0xff]  ;;  %v39_v35 = vld [vmem:[%s1160_s2 + $0x60] sm:$0xff]  ;;  %v62_v36 = vld [vmem:[%s1160_s2 + $0x118] sm:$0xff] }
  0x1a   :  { %v63_v37 = vld [vmem:[%s1160_s2 + $0x120] sm:$0xff]  ;;  %v40_v38 = vld [vmem:[%s1160_s2 + $0x68] sm:$0xff]  ;;  %v41_v39 = vld [vmem:[%s1160_s2 + $0x70] sm:$0xff] }
  0x1b   :  { %857 = vmatpush3.bf16.msra.mxu0 %v854_v9  ;;  %v64_v40 = vld [vmem:[%s1160_s2 + $0x128] sm:$0xff]  ;;  %v65_v41 = vld [vmem:[%s1160_s2 + $0x130] sm:$0xff]  ;;  %v42_v42 = vld [vmem:[%s1160_s2 + $0x78] sm:$0xff] }
  0x1c   :  { %859 = vmatprep.subr.bf16.mxu0 %v858_v12  ;;  %868 = vmatpush3.bf16.msra.mxu1 %v854_v9  ;;  %v43_v43 = vld [vmem:[%s1160_s2 + $0x80] sm:$0xff]  ;;  %v66_v44 = vld [vmem:[%s1160_s2 + $0x138] sm:$0xff]  ;;  %v44_v46 = vld [vmem:[%s1160_s2 + $0x88] sm:$0xff] }
  0x1d   :  { %865 = vmatprep.subr.bf16.mxu1 %v858_v12  ;;  %v67_v45 = vld [vmem:[%s1160_s2 + $0x140] sm:$0xff]  ;;  %v45_v47 = vld [vmem:[%s1160_s2 + $0x90] sm:$0xff]  ;;  %v68_v48 = vld [vmem:[%s1160_s2 + $0x148] sm:$0xff] }
  0x1e   :  { %v69_v49 = vld [vmem:[%s1160_s2 + $0x150] sm:$0xff]  ;;  %v46_v50 = vld [vmem:[%s1160_s2 + $0x98] sm:$0xff]  ;;  %v47_v51 = vld [vmem:[%s1160_s2 + $0xa0] sm:$0xff] }
  0x1f   :  { %861 = vmatpush3.bf16.msra.mxu0 %v858_v12  ;;  %v70_v52 = vld [vmem:[%s1160_s2 + $0x158] sm:$0xff]  ;;  %v71_v53 = vld [vmem:[%s1160_s2 + $0x160] sm:$0xff]  ;;  %v48_v54 = vld [vmem:[%s1160_s2 + $0xa8] sm:$0xff] }
  0x20   :  { %869 = vmatpush3.bf16.msra.mxu1 %v858_v12  ;;  %v49_v55 = vld [vmem:[%s1160_s2 + $0xb0] sm:$0xff]  ;;  %v72_v56 = vld [vmem:[%s1160_s2 + $0x168] sm:$0xff]  ;;  %v50_v58 = vld [vmem:[%s1160_s2 + $0xb8] sm:$0xff] }
  0x21   :  { %v73_v57 = vld [vmem:[%s1160_s2 + $0x170] sm:$0xff]  ;;  %v74_v59 = vld [vmem:[%s1160_s2 + $0x178] sm:$0xff]  ;;  %s701_s2 = sld [smem:[#allocation2 + $0x1]] }
  0x22   :  { %775 = vmatmul.mubr.msk.f32.vlgmr.msra.gmra.mrb[0].mxu0 %vm83_vm0, %v28_v14 }
  0x23   :  { %777 = vmatprep.mubr.msk.f32.mxu0 %vm83_vm0, %v29_v15  ;;  %811 = vmatmul.mubr.msk.f32.vlgmr.msra.gmra.mrb[0].mxu1 %vm83_vm0, %v52_v16 }
  0x24   :  { %813 = vmatprep.mubr.msk.f32.mxu1 %vm83_vm0, %v53_v17 }
  0x26   :  { %778 = vmatmul.mubr.msk.f32.gmra.mrb[2].mxu0 %vm83_vm0, %v30_v18 }
  0x27   :  { %780 = vmatprep.mubr.msk.f32.mxu0 %vm83_vm0, %v31_v19  ;;  %814 = vmatmul.mubr.msk.f32.gmra.mrb[2].mxu1 %vm83_vm0, %v54_v20 }
  0x28   :  { %816 = vmatprep.mubr.msk.f32.mxu1 %vm83_vm0, %v55_v21 }
  0x2a   :  { %781 = vmatmul.mubr.msk.f32.gmra.mrb[4].mxu0 %vm83_vm0, %v32_v22 }
  0x2b   :  { %783 = vmatprep.mubr.msk.f32.mxu0 %vm83_vm0, %v33_v23  ;;  %817 = vmatmul.mubr.msk.f32.gmra.mrb[4].mxu1 %vm83_vm0, %v56_v24 }
  0x2c   :  { %819 = vmatprep.mubr.msk.f32.mxu1 %vm83_vm0, %v57_v25 }
  0x2e   :  { %784 = vmatmul.mubr.msk.f32.gmra.mrb[6].mxu0 %vm83_vm0, %v34_v26 }
  0x2f   :  { %786 = vmatprep.mubr.msk.f32.mxu0 %vm83_vm0, %v35_v27  ;;  %820 = vmatmul.mubr.msk.f32.gmra.mrb[6].mxu1 %vm83_vm0, %v58_v28 }
  0x30   :  { %822 = vmatprep.mubr.msk.f32.mxu1 %vm83_vm0, %v59_v29 }
  0x32   :  { %787 = vmatmul.mubr.msk.f32.gmra.mrb[8].mxu0 %vm83_vm0, %v36_v30 }
  0x33   :  { %789 = vmatprep.mubr.msk.f32.mxu0 %vm83_vm0, %v37_v31  ;;  %823 = vmatmul.mubr.msk.f32.gmra.mrb[8].mxu1 %vm83_vm0, %v60_v32 }
  0x34   :  { %825 = vmatprep.mubr.msk.f32.mxu1 %vm83_vm0, %v61_v33 }
  0x36   :  { %790 = vmatmul.mubr.msk.f32.gmra.mrb[10].mxu0 %vm83_vm0, %v38_v34 }
  0x37   :  { %792 = vmatprep.mubr.msk.f32.mxu0 %vm83_vm0, %v39_v35  ;;  %826 = vmatmul.mubr.msk.f32.gmra.mrb[10].mxu1 %vm83_vm0, %v62_v36 }
  0x38   :  { %828 = vmatprep.mubr.msk.f32.mxu1 %vm83_vm0, %v63_v37 }
  0x3a   :  { %793 = vmatmul.mubr.msk.f32.gmra.mrb[12].mxu0 %vm83_vm0, %v40_v38 }
  0x3b   :  { %795 = vmatprep.mubr.msk.f32.mxu0 %vm83_vm0, %v41_v39  ;;  %829 = vmatmul.mubr.msk.f32.gmra.mrb[12].mxu1 %vm83_vm0, %v64_v40 }
  0x3c   :  { %831 = vmatprep.mubr.msk.f32.mxu1 %vm83_vm0, %v65_v41 }
  0x3e   :  { %796 = vmatmul.mubr.msk.f32.gmra.mrb[14].mxu0 %vm83_vm0, %v42_v42 }
  0x3f   :  { %798 = vmatprep.mubr.msk.f32.mxu0 %vm83_vm0, %v43_v43  ;;  %832 = vmatmul.mubr.msk.f32.gmra.mrb[14].mxu1 %vm83_vm0, %v66_v44  ;;  %v629_v44 = vlaneseq }
  0x40   :  { %834 = vmatprep.mubr.msk.f32.mxu1 %vm83_vm0, %v67_v45 }
  0x41   :  { %v630_v45 = vshrl.u32 %v629_v44, 7 }
  0x42   :  { %799 = vmatmul.mubr.msk.f32.gmra.mrb[16].mxu0 %vm83_vm0, %v44_v46  ;;  %v635_v46 = vstv %s701_s2 }
  0x43   :  { %801 = vmatprep.mubr.msk.f32.mxu0 %vm83_vm0, %v45_v47  ;;  %835 = vmatmul.mubr.msk.f32.gmra.mrb[16].mxu1 %vm83_vm0, %v68_v48  ;;  %vm633_vm1 = vcmp.eq.s32.totalorder %v630_v45, 1  ;;  %vm631_vm2 = vcmp.eq.s32.totalorder %v630_v45, 0  ;;  %v637_v48 = vstv %s632_s13 }
  0x44   :  { %837 = vmatprep.mubr.msk.f32.mxu1 %vm83_vm0, %v69_v49  ;;  %v636_v47 = vsel %vm633_vm1, %v635_v46, 0.0 }
  0x45   :  { %v638_v49 = vsel %vm631_vm2, %v637_v48, %v636_v47 }
  0x46   :  { %802 = vmatmul.mubr.msk.f32.gmra.mrb[18].mxu0 %vm83_vm0, %v46_v50 }
  0x47   :  { %804 = vmatprep.mubr.msk.f32.mxu0 %vm83_vm0, %v47_v51  ;;  %838 = vmatmul.mubr.msk.f32.gmra.mrb[18].mxu1 %vm83_vm0, %v70_v52 }
  0x48   :  { %840 = vmatprep.mubr.msk.f32.mxu1 %vm83_vm0, %v71_v53 }
  0x4a   :  { %805 = vmatmul.mubr.msk.f32.gmra.mrb[20].mxu0 %vm83_vm0, %v48_v54 }
  0x4b   :  { %807 = vmatprep.mubr.msk.f32.mxu0 %vm83_vm0, %v49_v55  ;;  %841 = vmatmul.mubr.msk.f32.gmra.mrb[20].mxu1 %vm83_vm0, %v72_v56 }
  0x4c   :  { %843 = vmatprep.mubr.msk.f32.mxu1 %vm83_vm0, %v73_v57 }
  0x4e   :  { %808 = vmatmul.mubr.msk.f32.gmra.mrb[22].mxu0 %vm83_vm0, %v50_v58 }
  0x4f   :  { %844 = vmatmul.mubr.msk.f32.gmra.mrb[22].mxu1 %vm83_vm0, %v74_v59 }
  0xf5   :  { %v776_v60 = vpop.f32.mrb[0].mxu0 }
  0xf6   :  { %v294_v61 = vpop.f32.mrb[1].mxu0  ;;  %v1125_v62 = vpop.f32.mrb[0].mxu1 }
  0xf7   :  { %533 = vxpose.xlu0.b32.start [1/16] (narrow) %v294_v61, 8  ;;  %v1127_v63 = vpop.f32.mrb[1].mxu1 }
  0xf9   :  { %v779_v0 = vpop.f32.mrb[2].mxu0 }
  0xfa   :  { %v304_v1 = vpop.f32.mrb[3].mxu0  ;;  %v1129_v2 = vpop.f32.mrb[2].mxu1 }
  0xfb   :  { %534 = vxpose.xlu0.b32.cont [2/16] (narrow) %v776_v60, 8  ;;  %v1131_v3 = vpop.f32.mrb[3].mxu1 }
  0xfd   :  { %v782_v4 = vpop.f32.mrb[4].mxu0 }
  0xfe   :  { %v314_v5 = vpop.f32.mrb[5].mxu0  ;;  %v1133_v6 = vpop.f32.mrb[4].mxu1 }
  0xff   :  { %535 = vxpose.xlu0.b32.cont [3/16] (narrow) %v304_v1, 8  ;;  %v1135_v7 = vpop.f32.mrb[5].mxu1 }
 0x101   :  { %v785_v8 = vpop.f32.mrb[6].mxu0 }
 0x102   :  { %v324_v9 = vpop.f32.mrb[7].mxu0  ;;  %v1137_v10 = vpop.f32.mrb[6].mxu1 }
 0x103   :  { %536 = vxpose.xlu0.b32.cont [4/16] (narrow) %v779_v0, 8  ;;  %v1139_v11 = vpop.f32.mrb[7].mxu1 }
 0x105   :  { %v788_v12 = vpop.f32.mrb[8].mxu0 }
 0x106   :  { %v334_v13 = vpop.f32.mrb[9].mxu0  ;;  %v824_v14 = vpop.f32.mrb[8].mxu1 }
 0x107   :  { %537 = vxpose.xlu0.b32.cont [5/16] (narrow) %v314_v5, 8  ;;  %v454_v15 = vpop.f32.mrb[9].mxu1 }
 0x109   :  { %v791_v16 = vpop.f32.mrb[10].mxu0 }
 0x10a   :  { %v344_v17 = vpop.f32.mrb[11].mxu0  ;;  %v827_v18 = vpop.f32.mrb[10].mxu1 }
 0x10b   :  { %538 = vxpose.xlu0.b32.cont [6/16] (narrow) %v782_v4, 8  ;;  %v464_v19 = vpop.f32.mrb[11].mxu1 }
 0x10d   :  { %v794_v20 = vpop.f32.mrb[12].mxu0 }
 0x10e   :  { %v354_v21 = vpop.f32.mrb[13].mxu0  ;;  %v830_v22 = vpop.f32.mrb[12].mxu1 }
 0x10f   :  { %539 = vxpose.xlu0.b32.cont [7/16] (narrow) %v324_v9, 8  ;;  %v474_v23 = vpop.f32.mrb[13].mxu1 }
 0x111   :  { %v797_v24 = vpop.f32.mrb[14].mxu0 }
 0x112   :  { %v364_v25 = vpop.f32.mrb[15].mxu0  ;;  %v833_v26 = vpop.f32.mrb[14].mxu1 }
 0x113   :  { %540 = vxpose.xlu0.b32.cont [8/16] (narrow) %v785_v8, 8  ;;  %v484_v27 = vpop.f32.mrb[15].mxu1 }
 0x115   :  { %v800_v28 = vpop.f32.mrb[16].mxu0 }
 0x116   :  { %v374_v29 = vpop.f32.mrb[17].mxu0  ;;  %v836_v30 = vpop.f32.mrb[16].mxu1 }
 0x117   :  { %541 = vxpose.xlu0.b32.cont [9/16] (narrow) %v334_v13, 8  ;;  %565 = vxpose.xlu1.b32.start [1/16] (narrow) %v374_v29, 8  ;;  %v494_v31 = vpop.f32.mrb[17].mxu1 }
 0x119   :  { %v803_v32 = vpop.f32.mrb[18].mxu0 }
 0x11a   :  { %v384_v33 = vpop.f32.mrb[19].mxu0  ;;  %v839_v34 = vpop.f32.mrb[18].mxu1 }
 0x11b   :  { %542 = vxpose.xlu0.b32.cont [10/16] (narrow) %v788_v12, 8  ;;  %566 = vxpose.xlu1.b32.cont [2/16] (narrow) %v800_v28, 8  ;;  %v504_v35 = vpop.f32.mrb[19].mxu1 }
 0x11d   :  { %v806_v36 = vpop.f32.mrb[20].mxu0 }
 0x11e   :  { %v394_v37 = vpop.f32.mrb[21].mxu0  ;;  %v842_v38 = vpop.f32.mrb[20].mxu1 }
 0x11f   :  { %543 = vxpose.xlu0.b32.cont [11/16] (narrow) %v344_v17, 8  ;;  %567 = vxpose.xlu1.b32.cont [3/16] (narrow) %v384_v33, 8  ;;  %v514_v39 = vpop.f32.mrb[21].mxu1 }
 0x121   :  { %v809_v40 = vpop.f32.mrb[22].mxu0 }
 0x122   :  { %v404_v41 = vpop.f32.mrb[23].mxu0  ;;  %v845_v42 = vpop.f32.mrb[22].mxu1 }
 0x123   :  { %544 = vxpose.xlu0.b32.cont [12/16] (narrow) %v791_v16, 8  ;;  %568 = vxpose.xlu1.b32.cont [4/16] (narrow) %v803_v32, 8  ;;  %v524_v43 = vpop.f32.mrb[23].mxu1 }
 0x127   :  { %545 = vxpose.xlu0.b32.cont [13/16] (narrow) %v354_v21, 8  ;;  %569 = vxpose.xlu1.b32.cont [5/16] (narrow) %v394_v37, 8 }
 0x12b   :  { %546 = vxpose.xlu0.b32.cont [14/16] (narrow) %v794_v20, 8  ;;  %570 = vxpose.xlu1.b32.cont [6/16] (narrow) %v806_v36, 8 }
 0x12f   :  { %547 = vxpose.xlu0.b32.cont [15/16] (narrow) %v364_v25, 8  ;;  %571 = vxpose.xlu1.b32.cont [7/16] (narrow) %v404_v41, 8 }
 0x133   :  { %548 = vxpose.xlu0.b32.end [16/16] (narrow) %v797_v24, 8  ;;  %572 = vxpose.xlu1.b32.cont [8/16] (narrow) %v809_v40, 8 }
 0x137   :  { %597 = vxpose.xlu0.b32.start [1/16] (narrow) %v454_v15, 8  ;;  %573 = vxpose.xlu1.b32.cont [9/16] (narrow) %v1127_v63, 8 }
 0x13b   :  { %598 = vxpose.xlu0.b32.cont [2/16] (narrow) %v824_v14, 8  ;;  %574 = vxpose.xlu1.b32.cont [10/16] (narrow) %v1125_v62, 8 }
 0x13f   :  { %599 = vxpose.xlu0.b32.cont [3/16] (narrow) %v464_v19, 8  ;;  %575 = vxpose.xlu1.b32.cont [11/16] (narrow) %v1131_v3, 8 }
 0x143   :  { %600 = vxpose.xlu0.b32.cont [4/16] (narrow) %v827_v18, 8  ;;  %576 = vxpose.xlu1.b32.cont [12/16] (narrow) %v1129_v2, 8 }
 0x147   :  { %601 = vxpose.xlu0.b32.cont [5/16] (narrow) %v474_v23, 8  ;;  %577 = vxpose.xlu1.b32.cont [13/16] (narrow) %v1135_v7, 8 }
 0x14b   :  { %602 = vxpose.xlu0.b32.cont [6/16] (narrow) %v830_v22, 8  ;;  %578 = vxpose.xlu1.b32.cont [14/16] (narrow) %v1133_v6, 8 }
 0x14f   :  { %603 = vxpose.xlu0.b32.cont [7/16] (narrow) %v484_v27, 8  ;;  %579 = vxpose.xlu1.b32.cont [15/16] (narrow) %v1139_v11, 8 }
 0x153   :  { %604 = vxpose.xlu0.b32.cont [8/16] (narrow) %v833_v26, 8  ;;  %580 = vxpose.xlu1.b32.end [16/16] (narrow) %v1137_v10, 8 }
 0x157   :  { %605 = vxpose.xlu0.b32.cont [9/16] (narrow) %v494_v31, 8 }
 0x15b   :  { %606 = vxpose.xlu0.b32.cont [10/16] (narrow) %v836_v30, 8 }
 0x15f   :  { %607 = vxpose.xlu0.b32.cont [11/16] (narrow) %v504_v35, 8 }
 0x163   :  { %608 = vxpose.xlu0.b32.cont [12/16] (narrow) %v839_v34, 8 }
 0x167   :  { %609 = vxpose.xlu0.b32.cont [13/16] (narrow) %v514_v39, 8 }
 0x16b   :  { %610 = vxpose.xlu0.b32.cont [14/16] (narrow) %v842_v38, 8 }
 0x16f   :  { %611 = vxpose.xlu0.b32.cont [15/16] (narrow) %v524_v43, 8 }
 0x173   :  { %612 = vxpose.xlu0.b32.end [16/16] (narrow) %v845_v42, 8 }
 0x177   :  { %v549_v50 = vpop.trf.xlu0 }
 0x178   :  { %v639_v51 = vadd.f32 %v638_v49, %v549_v50 }
 0x17a   :  { %v642_v52 = vmax.f32 %v639_v51, 0.0 }
 0x17c   :  { %645 = vst [vmem:[%s1161_s3] sm:$0xff] %v642_v52 }
 0x197   :  { %v581_v53 = vpop.trf.xlu1 }
 0x198   :  { %v640_v54 = vadd.f32 %v638_v49, %v581_v53 }
 0x19a   :  { %v643_v55 = vmax.f32 %v640_v54, 0.0 }
 0x19c   :  { %646 = vst [vmem:[%s1161_s3 + $0x8] sm:$0xff] %v643_v55 }
 0x1b7   :  { %v613_v56 = vpop.trf.xlu0 }
 0x1b8   :  { %v641_v57 = vadd.f32 %v638_v49, %v613_v56 }
 0x1ba   :  { %v644_v58 = vmax.f32 %v641_v57, 0.0 }
 0x1bc   :  { %647 = vst [vmem:[%s1161_s3 + $0x10] sm:$0xff] %v644_v58 }
 0x1bd   :  { %652 = vsyncpa [#allocation3], 1 }

</bundles_post_ra>
